<compile_context>
chip_gen: v6e
topology: v6e:2x2x1
jax: 0.10.0
libtpu: 0.0.40
codegen_flags: <defaults>
</compile_context>

<pallas_src>
import math
import numpy as np
import jax
import jax.numpy as jnp
from jax.experimental import pallas as pl
from jax.experimental.pallas import tpu as pltpu

BN_EPS = 1e-5
MXU_DTYPE = jnp.bfloat16     # MXU operand dtype; accumulation stays float32


def _round_up(v, m):
    return (v + m - 1) // m * m


# ----------------------------------------------------------------------------
# Pallas kernels
# ----------------------------------------------------------------------------
def _matmul_scale_relu_kernel(x_ref, w_ref, s_ref, b_ref, o_ref):
    # x: (TM, Cin) f32, w: (Cin, Cout) bf16, s/b: (1, Cout) f32, o: (TM, Cout) f32
    acc = jnp.dot(x_ref[...].astype(MXU_DTYPE), w_ref[...],
                  preferred_element_type=jnp.float32)
    acc = acc * s_ref[...] + b_ref[...]
    o_ref[...] = jnp.maximum(acc, 0.0).astype(o_ref.dtype)


def _conv3x3_concat_bn_relu_kernel(x1_ref, x2_ref, w_ref, s_ref, b_ref, o_ref):
    # x1/x2: (1, H+2, W+2, C) zero-padded halves of the channel concat (one batch element)
    # w: (9*2C, Cout) bf16 flattened in (ky, kx, cin) major->minor order, s/b: (1, Cout)
    # o: (1, H, W, Cout)
    _, H, W, Cout = o_ref.shape
    C = x1_ref.shape[-1]
    x1 = x1_ref[0]
    x2 = x2_ref[0]
    # im2col built once in VMEM: a single wide contraction (K = 18*C) for the MXU instead of
    # 18 tiny K=C matmuls; the reshape happens once on the stacked tensor.
    taps = []
    for dy in range(3):
        for dx in range(3):
            taps.append(x1[dy:dy + H, dx:dx + W, :])
            taps.append(x2[dy:dy + H, dx:dx + W, :])
    xs = jnp.concatenate(taps, axis=-1).reshape(H * W, 18 * C).astype(MXU_DTYPE)
    acc = jnp.dot(xs, w_ref[...], preferred_element_type=jnp.float32)
    acc = acc * s_ref[...] + b_ref[...]
    # TODO(synk): Cout < 128 -> masked lane stores; pad channels at real model widths.
    o_ref[0] = jnp.maximum(acc, 0.0).reshape(H, W, Cout).astype(o_ref.dtype)


def _bilinear_phase_taps(f):
    # fill_up_weights separable filter g decomposed per output phase r in [0, f):
    #   output[q*f + r] = sum_d g[r + pad - d*f] * x[q + d],   d in {-1, 0, 1}
    # (exactly 2 taps per phase for even f; boundaries handled by a 1-pixel zero pad).
    c = (2 * f - 1 - f % 2) / (2.0 * f)
    g = [1.0 - abs(i / f - c) for i in range(2 * f)]
    pad = f // 2
    taps = []
    for r in range(f):
        tr = []
        for d in (-1, 0, 1):
            k = r + pad - d * f
            if 0 <= k < 2 * f:
                tr.append((d, g[k]))
        taps.append(tr)
    return taps


def _make_bilinear_up_kernel(f, H, W, C):
    taps = _bilinear_phase_taps(f)

    def kernel(x_ref, o_ref):
        # x_ref: (1, H+2, W+2, C) zero-padded ORIGINAL input; o_ref: (H, f, W, f*C)
        x = x_ref[0]
        # the (at most) 9 shifted views of the original input — no zero-inserted tensor
        sl = {}
        for dy in (-1, 0, 1):
            for dx in (-1, 0, 1):
                sl[(dy, dx)] = x[1 + dy:1 + dy + H, 1 + dx:1 + dx + W, :]
        for ry in range(f):
            row_parts = []
            for rx in range(f):
                acc = None
                for dy, wy in taps[ry]:
                    for dx, wx in taps[rx]:
                        term = (wy * wx) * sl[(dy, dx)]
                        acc = term if acc is None else acc + term
                row_parts.append(acc)
            # lane-pack the f x-phases -> (H, W, f*C); one full-width store per ry
            o_ref[:, ry, :, :] = jnp.concatenate(row_parts, axis=-1).astype(o_ref.dtype)

    return kernel


# ----------------------------------------------------------------------------
# Wrappers (JAX glue + pallas_call)
# ----------------------------------------------------------------------------
def conv1x1_bn_relu(x, w, scale, bias):
    # x: (N, H, W, Cin), w: (Cin, Cout)
    N, H, W, Cin = x.shape
    Cout = w.shape[1]
    M = N * H * W
    TM = min(512, _round_up(M, 8))          # row tile (multiple of 8 sublanes)
    Mp = _round_up(M, TM)
    x2 = x.reshape(M, Cin)
    if Mp != M:
        x2 = jnp.pad(x2, ((0, Mp - M), (0, 0)))
    flops = 2 * Mp * Cin * Cout
    bytes_accessed = Mp * Cin * 4 + Cin * Cout * 2 + Mp * Cout * 4 + 8 * Cout
    out = pl.pallas_call(
        _matmul_scale_relu_kernel,
        out_shape=jax.ShapeDtypeStruct((Mp, Cout), x.dtype),
        grid=(Mp // TM,),
        in_specs=[
            pl.BlockSpec((TM, Cin), lambda i: (i, 0)),
            pl.BlockSpec((Cin, Cout), lambda i: (0, 0)),
            pl.BlockSpec((1, Cout), lambda i: (0, 0)),
            pl.BlockSpec((1, Cout), lambda i: (0, 0)),
        ],
        out_specs=pl.BlockSpec((TM, Cout), lambda i: (i, 0)),
        compiler_params=pltpu.CompilerParams(dimension_semantics=("parallel",)),
        cost_estimate=pl.CostEstimate(flops=flops, transcendentals=0,
                                      bytes_accessed=bytes_accessed),
    )(x2, w.astype(MXU_DTYPE), scale.reshape(1, Cout), bias.reshape(1, Cout))
    return out[:M].reshape(N, H, W, Cout)


def conv3x3_concat_bn_relu(x1, x2, w, scale, bias):
    # conv3x3(concat([x1, x2], channel)) + BN + ReLU; the concat is fused into the kernel.
    # x1, x2: (N, H, W, C), w: (3, 3, 2*C, Cout)
    N, H, W, C = x1.shape
    assert x2.shape == x1.shape
    Cout = w.shape[-1]
    x1p = jnp.pad(x1, ((0, 0), (1, 1), (1, 1), (0, 0)))
    x2p = jnp.pad(x2, ((0, 0), (1, 1), (1, 1), (0, 0)))
    w2 = w.reshape(9 * 2 * C, Cout).astype(MXU_DTYPE)
    flops = 2 * N * H * W * (18 * C) * Cout
    bytes_accessed = (2 * N * (H + 2) * (W + 2) * C * 4
                      + 18 * C * Cout * 2 + N * H * W * Cout * 4)
    return pl.pallas_call(
        _conv3x3_concat_bn_relu_kernel,
        out_shape=jax.ShapeDtypeStruct((N, H, W, Cout), x1.dtype),
        grid=(N,),
        in_specs=[
            pl.BlockSpec((1, H + 2, W + 2, C), lambda n: (n, 0, 0, 0)),
            pl.BlockSpec((1, H + 2, W + 2, C), lambda n: (n, 0, 0, 0)),
            pl.BlockSpec((9 * 2 * C, Cout), lambda n: (0, 0)),
            pl.BlockSpec((1, Cout), lambda n: (0, 0)),
            pl.BlockSpec((1, Cout), lambda n: (0, 0)),
        ],
        out_specs=pl.BlockSpec((1, H, W, Cout), lambda n: (n, 0, 0, 0)),
        compiler_params=pltpu.CompilerParams(dimension_semantics=("parallel",)),
        cost_estimate=pl.CostEstimate(flops=flops, transcendentals=0,
                                      bytes_accessed=bytes_accessed),
    )(x1p, x2p, w2, scale.reshape(1, Cout), bias.reshape(1, Cout))


def bilinear_upsample(x, f):
    # Equivalent of nn.ConvTranspose2d(C, C, 2f, stride=f, padding=f//2, groups=C, bias=False)
    # with fill_up_weights weights, for even f (DLA upsampling factors are powers of two).
    N, H, W, C = x.shape
    assert f % 2 == 0, "polyphase upsample implemented for even factors"
    xp = jnp.pad(x, ((0, 0), (1, 1), (1, 1), (0, 0)))
    flops = 7 * N * H * W * f * f * C
    bytes_accessed = N * (H + 2) * (W + 2) * C * 4 + N * H * W * f * f * C * 4
    out = pl.pallas_call(
        _make_bilinear_up_kernel(f, H, W, C),
        out_shape=jax.ShapeDtypeStruct((N * H, f, W, f * C), x.dtype),
        grid=(N,),
        in_specs=[pl.BlockSpec((1, H + 2, W + 2, C), lambda n: (n, 0, 0, 0))],
        out_specs=pl.BlockSpec((H, f, W, f * C), lambda n: (n, 0, 0, 0)),
        compiler_params=pltpu.CompilerParams(dimension_semantics=("parallel",)),
        cost_estimate=pl.CostEstimate(flops=flops, transcendentals=0,
                                      bytes_accessed=bytes_accessed),
    )(xp)
    # (N*H, f, W, f*C) -> (N, H*f, W*f, C) is a contiguous reshape: no transpose pass.
    return out.reshape(N, H * f, W * f, C)


def _bilinear_upsample_ref(x, f):
    # dense zero-insertion reference (only used for a small self-check in __main__)
    N, H, W, C = x.shape
    c = (2 * f - 1 - f % 2) / (2.0 * f)
    g = [1.0 - abs(i / f - c) for i in range(2 * f)]
    z = jnp.zeros((N, (H - 1) * f + 1, (W - 1) * f + 1, C), jnp.float32)
    z = z.at[:, ::f, ::f, :].set(x)
    p = 2 * f - 1 - f // 2
    z = jnp.pad(z, ((0, 0), (p, p), (p, p), (0, 0)))
    Ho, Wo = H * f, W * f
    out = jnp.zeros((N, Ho, Wo, C), jnp.float32)
    K = 2 * f
    for ky in range(K):
        for kx in range(K):
            out = out + g[K - 1 - ky] * g[K - 1 - kx] * z[:, ky:ky + Ho, kx:kx + Wo, :]
    return out


# ----------------------------------------------------------------------------
# Parameter construction (deterministic, mirrors the PyTorch __init__)
# ----------------------------------------------------------------------------
def _bn_fold():
    # gamma=1, beta=0, running_mean=0, running_var=1  (PyTorch init_weights + defaults)
    scale = jnp.full((1,), 1.0 / math.sqrt(1.0 + BN_EPS), jnp.float32)
    return scale, jnp.zeros((1,), jnp.float32)


def make_idaup_params(key, out_dim, channels, up_factors):
    params = {"projs": [], "ups": [], "nodes": []}
    for i, c in enumerate(channels):
        if c == out_dim:
            params["projs"].append(None)  # nn.Identity
        else:
            key, k1 = jax.random.split(key)
            n = 1 * 1 * out_dim
            w = jax.random.normal(k1, (c, out_dim), jnp.float32) * math.sqrt(2.0 / n)
            s, b = _bn_fold()
            params["projs"].append((w, jnp.broadcast_to(s, (out_dim,)),
                                    jnp.broadcast_to(b, (out_dim,))))
        params["ups"].append(int(up_factors[i]))
    for _ in range(1, len(channels)):
        key, k1 = jax.random.split(key)
        n = 3 * 3 * out_dim
        w = jax.random.normal(k1, (3, 3, 2 * out_dim, out_dim), jnp.float32) * math.sqrt(2.0 / n)
        s, b = _bn_fold()
        params["nodes"].append((w, jnp.broadcast_to(s, (out_dim,)),
                                jnp.broadcast_to(b, (out_dim,))))
    return params, key


def make_dlaup_params(key, channels, scales):
    channels = list(channels)
    in_channels = list(channels)
    scales = np.array(scales, dtype=int)
    idas = []
    for i in range(len(channels) - 1):
        j = -i - 2
        p, key = make_idaup_params(key, channels[j], in_channels[j:],
                                   scales[j:] // scales[j])
        idas.append(p)
        scales[j + 1:] = scales[j]
        in_channels[j + 1:] = [channels[j] for _ in channels[j + 1:]]
    return idas


# ----------------------------------------------------------------------------
# Forward passes
# ----------------------------------------------------------------------------
def idaup_forward(params, layers):
    layers = list(layers)
    for i, l in enumerate(layers):
        proj = params["projs"][i]
        if proj is not None:
            l = conv1x1_bn_relu(l, *proj)
        f = params["ups"][i]
        if f > 1:
            l = bilinear_upsample(l, f)
        layers[i] = l
    x = layers[0]
    y = []
    for i in range(1, len(layers)):
        w, s, b = params["nodes"][i - 1]
        x = conv3x3_concat_bn_relu(x, layers[i], w, s, b)   # concat fused into the kernel
        y.append(x)
    return x, y


def dlaup_forward(ida_params, layers):
    layers = list(layers)
    assert len(layers) > 1
    x = None
    for i in range(len(layers) - 1):
        x, y = idaup_forward(ida_params[i], layers[-i - 2:])
        layers[-i - 1:] = y
    return x


# ----------------------------------------------------------------------------
# Main
# ----------------------------------------------------------------------------
if __name__ == "__main__":
    key = jax.random.PRNGKey(0)
    channels = [4, 8, 16, 32]
    scales = (1, 2, 4, 8)
    N, base = 2, 16

    keys = jax.random.split(key, len(channels) + 1)
    # PyTorch-convention NCHW inputs (one per pyramid level)
    layers_nchw = []
    for idx, (c, s) in enumerate(zip(channels, scales)):
        h = base // s
        layers_nchw.append(jax.random.normal(keys[idx], (N, c, h, h), jnp.float32))

    ida_params = make_dlaup_params(keys[-1], channels, scales)

    # layout: convert NCHW -> NHWC for the Pallas kernels
    layers_nhwc = [jnp.transpose(l, (0, 2, 3, 1)) for l in layers_nchw]

    # small self-check: polyphase upsample kernel vs dense zero-insertion reference (pure f32)
    xchk = jax.random.normal(jax.random.PRNGKey(1), (2, 4, 4, 8), jnp.float32)
    up_ref = _bilinear_upsample_ref(xchk, 2)
    up_ker = bilinear_upsample(xchk, 2)
    jax.block_until_ready(up_ker)
    assert jnp.allclose(up_ker, up_ref, atol=1e-4, rtol=1e-4), \
        float(jnp.max(jnp.abs(up_ker - up_ref)))

    out_nhwc = dlaup_forward(ida_params, layers_nhwc)
    out_nchw = jnp.transpose(out_nhwc, (0, 3, 1, 2))
    jax.block_until_ready(out_nchw)

    assert out_nchw.shape == (N, channels[0], base, base), out_nchw.shape
    assert jnp.all(jnp.isfinite(out_nchw))
    print("KERNEL_OK")
</pallas_src>

<mosaic_0001>
module attributes {stable_mosaic.version = 11 : i64} {
  func.func @kernel(%arg0: i32, %arg1: memref<1x6x6x8xf32, #tpu.memory_space<vmem>>, %arg2: memref<4x2x4x16xf32, #tpu.memory_space<vmem>>) attributes {dimension_semantics = [#tpu.dimension_semantics<parallel>], iteration_bounds = array<i64: 2>, scalar_prefetch = 0 : i64, scratch_operands = 0 : i64, tpu.core_type = #tpu.core_type<tc>, window_params = [{transform_indices = @transform_0, window_bounds = array<i64: 1, 6, 6, 8>}, {transform_indices = @transform_1, window_bounds = array<i64: 4, 2, 4, 16>}]} {
    %c0 = arith.constant 0 : index
    %c0_0 = arith.constant 0 : index
    %c0_1 = arith.constant 0 : index
    %c0_2 = arith.constant 0 : index
    %0 = vector.load %arg1[%c0, %c0_0, %c0_1, %c0_2] : memref<1x6x6x8xf32, #tpu.memory_space<vmem>>, vector<1x6x6x8xf32>
    %1 = vector.shape_cast %0 : vector<1x6x6x8xf32> to vector<6x6x8xf32>
    %2 = vector.extract_strided_slice %1 {offsets = [0, 0, 0], sizes = [4, 4, 8], strides = [1, 1, 1]} : vector<6x6x8xf32> to vector<4x4x8xf32>
    %3 = vector.extract_strided_slice %1 {offsets = [0, 1, 0], sizes = [4, 4, 8], strides = [1, 1, 1]} : vector<6x6x8xf32> to vector<4x4x8xf32>
    %4 = vector.extract_strided_slice %1 {offsets = [0, 2, 0], sizes = [4, 4, 8], strides = [1, 1, 1]} : vector<6x6x8xf32> to vector<4x4x8xf32>
    %5 = vector.extract_strided_slice %1 {offsets = [1, 0, 0], sizes = [4, 4, 8], strides = [1, 1, 1]} : vector<6x6x8xf32> to vector<4x4x8xf32>
    %6 = vector.extract_strided_slice %1 {offsets = [1, 1, 0], sizes = [4, 4, 8], strides = [1, 1, 1]} : vector<6x6x8xf32> to vector<4x4x8xf32>
    %7 = vector.extract_strided_slice %1 {offsets = [1, 2, 0], sizes = [4, 4, 8], strides = [1, 1, 1]} : vector<6x6x8xf32> to vector<4x4x8xf32>
    %8 = vector.extract_strided_slice %1 {offsets = [2, 0, 0], sizes = [4, 4, 8], strides = [1, 1, 1]} : vector<6x6x8xf32> to vector<4x4x8xf32>
    %9 = vector.extract_strided_slice %1 {offsets = [2, 1, 0], sizes = [4, 4, 8], strides = [1, 1, 1]} : vector<6x6x8xf32> to vector<4x4x8xf32>
    %10 = vector.extract_strided_slice %1 {offsets = [2, 2, 0], sizes = [4, 4, 8], strides = [1, 1, 1]} : vector<6x6x8xf32> to vector<4x4x8xf32>
    %cst = arith.constant 6.250000e-02 : f32
    %11 = vector.broadcast %cst : f32 to vector<4x4x8xf32>
    %12 = arith.mulf %11, %2 : vector<4x4x8xf32>
    %cst_3 = arith.constant 1.875000e-01 : f32
    %13 = vector.broadcast %cst_3 : f32 to vector<4x4x8xf32>
    %14 = arith.mulf %13, %3 : vector<4x4x8xf32>
    %15 = arith.addf %12, %14 : vector<4x4x8xf32>
    %cst_4 = arith.constant 1.875000e-01 : f32
    %16 = vector.broadcast %cst_4 : f32 to vector<4x4x8xf32>
    %17 = arith.mulf %16, %5 : vector<4x4x8xf32>
    %18 = arith.addf %15, %17 : vector<4x4x8xf32>
    %cst_5 = arith.constant 5.625000e-01 : f32
    %19 = vector.broadcast %cst_5 : f32 to vector<4x4x8xf32>
    %20 = arith.mulf %19, %6 : vector<4x4x8xf32>
    %21 = arith.addf %18, %20 : vector<4x4x8xf32>
    %cst_6 = arith.constant 1.875000e-01 : f32
    %22 = vector.broadcast %cst_6 : f32 to vector<4x4x8xf32>
    %23 = arith.mulf %22, %3 : vector<4x4x8xf32>
    %cst_7 = arith.constant 6.250000e-02 : f32
    %24 = vector.broadcast %cst_7 : f32 to vector<4x4x8xf32>
    %25 = arith.mulf %24, %4 : vector<4x4x8xf32>
    %26 = arith.addf %23, %25 : vector<4x4x8xf32>
    %cst_8 = arith.constant 5.625000e-01 : f32
    %27 = vector.broadcast %cst_8 : f32 to vector<4x4x8xf32>
    %28 = arith.mulf %27, %6 : vector<4x4x8xf32>
    %29 = arith.addf %26, %28 : vector<4x4x8xf32>
    %cst_9 = arith.constant 1.875000e-01 : f32
    %30 = vector.broadcast %cst_9 : f32 to vector<4x4x8xf32>
    %31 = arith.mulf %30, %7 : vector<4x4x8xf32>
    %32 = arith.addf %29, %31 : vector<4x4x8xf32>
    %33 = tpu.concatenate %21, %32 in 2 : vector<4x4x8xf32>, vector<4x4x8xf32> -> vector<4x4x16xf32>
    %c0_10 = arith.constant 0 : index
    %c0_11 = arith.constant 0 : index
    %c0_12 = arith.constant 0 : index
    %c0_13 = arith.constant 0 : index
    %34 = vector.load %arg2[%c0_10, %c0_11, %c0_12, %c0_13] : memref<4x2x4x16xf32, #tpu.memory_space<vmem>>, vector<4x1x4x16xf32>
    %35 = vector.shape_cast %34 : vector<4x1x4x16xf32> to vector<4x4x16xf32>
    %36 = vector.shape_cast %33 : vector<4x4x16xf32> to vector<4x1x4x16xf32>
    tpu.vector_store %arg2[%c0_10, %c0_11, %c0_12, %c0_13], %36 {strides = array<i32>} : memref<4x2x4x16xf32, #tpu.memory_space<vmem>>, vector<4x1x4x16xf32>,
    %cst_14 = arith.constant 1.875000e-01 : f32
    %37 = vector.broadcast %cst_14 : f32 to vector<4x4x8xf32>
    %38 = arith.mulf %37, %5 : vector<4x4x8xf32>
    %cst_15 = arith.constant 5.625000e-01 : f32
    %39 = vector.broadcast %cst_15 : f32 to vector<4x4x8xf32>
    %40 = arith.mulf %39, %6 : vector<4x4x8xf32>
    %41 = arith.addf %38, %40 : vector<4x4x8xf32>
    %cst_16 = arith.constant 6.250000e-02 : f32
    %42 = vector.broadcast %cst_16 : f32 to vector<4x4x8xf32>
    %43 = arith.mulf %42, %8 : vector<4x4x8xf32>
    %44 = arith.addf %41, %43 : vector<4x4x8xf32>
    %cst_17 = arith.constant 1.875000e-01 : f32
    %45 = vector.broadcast %cst_17 : f32 to vector<4x4x8xf32>
    %46 = arith.mulf %45, %9 : vector<4x4x8xf32>
    %47 = arith.addf %44, %46 : vector<4x4x8xf32>
    %cst_18 = arith.constant 5.625000e-01 : f32
    %48 = vector.broadcast %cst_18 : f32 to vector<4x4x8xf32>
    %49 = arith.mulf %48, %6 : vector<4x4x8xf32>
    %cst_19 = arith.constant 1.875000e-01 : f32
    %50 = vector.broadcast %cst_19 : f32 to vector<4x4x8xf32>
    %51 = arith.mulf %50, %7 : vector<4x4x8xf32>
    %52 = arith.addf %49, %51 : vector<4x4x8xf32>
    %cst_20 = arith.constant 1.875000e-01 : f32
    %53 = vector.broadcast %cst_20 : f32 to vector<4x4x8xf32>
    %54 = arith.mulf %53, %9 : vector<4x4x8xf32>
    %55 = arith.addf %52, %54 : vector<4x4x8xf32>
    %cst_21 = arith.constant 6.250000e-02 : f32
    %56 = vector.broadcast %cst_21 : f32 to vector<4x4x8xf32>
    %57 = arith.mulf %56, %10 : vector<4x4x8xf32>
    %58 = arith.addf %55, %57 : vector<4x4x8xf32>
    %59 = tpu.concatenate %47, %58 in 2 : vector<4x4x8xf32>, vector<4x4x8xf32> -> vector<4x4x16xf32>
    %c0_22 = arith.constant 0 : index
    %c1 = arith.constant 1 : index
    %c0_23 = arith.constant 0 : index
    %c0_24 = arith.constant 0 : index
    %60 = vector.load %arg2[%c0_22, %c1, %c0_23, %c0_24] : memref<4x2x4x16xf32, #tpu.memory_space<vmem>>, vector<4x1x4x16xf32>
    %61 = vector.shape_cast %60 : vector<4x1x4x16xf32> to vector<4x4x16xf32>
    %62 = vector.shape_cast %59 : vector<4x4x16xf32> to vector<4x1x4x16xf32>
    tpu.vector_store %arg2[%c0_22, %c1, %c0_23, %c0_24], %62 {strides = array<i32>} : memref<4x2x4x16xf32, #tpu.memory_space<vmem>>, vector<4x1x4x16xf32>,
    return
  }
  func.func @transform_0(%arg0: i32) -> (i32, i32, i32, i32) {
    %c0_i32 = arith.constant 0 : i32
    %c0_i32_0 = arith.constant 0 : i32
    %c0_i32_1 = arith.constant 0 : i32
    %c0_i32_2 = arith.constant 0 : i32
    return %arg0, %c0_i32, %c0_i32_0, %c0_i32_1 : i32, i32, i32, i32
  }
  func.func @transform_1(%arg0: i32) -> (i32, i32, i32, i32) {
    %c0_i32 = arith.constant 0 : i32
    %c0_i32_0 = arith.constant 0 : i32
    %c0_i32_1 = arith.constant 0 : i32
    %c0_i32_2 = arith.constant 0 : i32
    return %arg0, %c0_i32, %c0_i32_0, %c0_i32_1 : i32, i32, i32, i32
  }
}

</mosaic_0001>

<bundles_post_ra>
// kernel: tpu_custom_call.1
= control target key start
LH: loop header
LB: loop body
LE: loop exit
PB: predicated region body
PF: predicated region fallthrough
CT: control target
= control target key end

     0   :  { %6 = vsyncpa [#allocation3], 0  ;;  %s710_s0 = inlined_call_operand.vmem [shape: f32[2,6,6,8], index: 0, kind: input, shape index: {}]   ;;  %s711_s1 = inlined_call_operand.hbm [shape: f32[8,2,4,16], index: 1, kind: output, shape index: {}]  }
   0x1   :  { %8 = vsyncpa [#allocation3 + $0x1], 0  ;;  %s507_s6 = smov 0   ;;  %s509_s7 = smov 0  }
   0x2   :  { %s511_s8 = smov 0   ;;  %s513_s9 = smov 0  }
   0x3 LB: > { %s528_s10 = sadd.s32 4294967295, %s491_s9   ;;  %s370_s11 = sadd.s32 4294967294, %s491_s9   ;;  %s491_s9 = sphi %s513_s9, %s717_s9   ;;  %s487_s8 = sphi %s511_s8, %s716_s8   ;;  %s483_s7 = sphi %s509_s7, %s715_s7   ;;  %s479_s6 = sphi %s507_s6, %s714_s6  }
   0x4   : > { %s532_s12 = sadd.s32 1, %s491_s9   ;;  %s47_s13 = sadd.s32 1, %s487_s8 }
   0x5   : > { %s44_s14 = ssub.s32 %s491_s9, %s532_s12  ;;  %p57_p0 = scmp.ne.s32.totalorder %s487_s8, %s483_s7 }
   0x6   : > { %p45_p1 = scmp.eq.s32.totalorder %s44_s14, 0  ;;  %p58_p2 = scmp.eq.s32.totalorder %s528_s10, 1 }
   0x7   : > { %p63_p3 = scmp.ne.s32.totalorder %s483_s7, %s479_s6  ;;  %p64_p4 = scmp.eq.s32.totalorder %s370_s11, 1 }
   0x8   : > { %s543_s15 = scalar_select %p45_p1, %s487_s8, %s47_s13  }
   0x9   : > { %p545_p5 = por %p58_p2, %p57_p0  ;;  %p549_p6 = por %p64_p4, %p63_p3 }
   0xa   : > { %p373_p7 = scmp.ge.s32.totalorder %s491_s9, 1  ;;  %p90_p8 = scmp.lt.s32.totalorder %s491_s9, 3 }
   0xc   : > { %p91_p9 = pnand %p373_p7, %p90_p8 }
   0xd   : > { %p110_p10 = scmp.lt.s32.totalorder (!%p91_p9), %s528_s10, 1  ;;  %s493_s23 = smov (!%p91_p9), 8  }
   0xe   : > { %94 = sbr.rel (%p91_p9) target bundleno = 180 (0xb4), region = 24  ;;  %s107_s24 = sand.u32 (!%p91_p9), 1, %s483_s7  }
   0xf   : > { %s374_s25 = sshll.u32 (!%p91_p9), %s107_s24, 5  ;;  %s387_s27 = sshll.u32 (!%p91_p9), %s528_s10, 9 }
  0x10   : > { %s109_s26 = scalar_lea.vmem (!%p91_p9), [#allocation2], %s374_s25  ;;  %s660_s2 = scalar_lea.hbm (!%p91_p9), %s711_s1, %s387_s27 }
  0x11   : > { %s308_s28 = sshll.u32 (!%p91_p9), %s109_s26, 4  ;;  %s670_s3 = scalar_lea.sflag (!%p91_p9), [#allocation3], %s107_s24  ;;  %s662_s28 = int_to_ptr.vmem [resolvable:$true] %s308_s28 }
  0x12   : > { %s431_s4 = scalar_lea.vmem (!%p91_p9), %s662_s28, 512  ;;  %s494_s5 = smov (!%p91_p9), [#allocation2]  }
  0x13   : > { %s111_s18 = scalar_select %p110_p10, %s528_s10, 1  ;;  %vm218_vm0 = vcmask 64512   ;;  %vm223_vm1 = vcmask 125952  }
  0x14   : > { %p432_p11 = scmp.ne.s32.totalorder %s662_s28, %s431_s4  ;;  %s435_s10 = sshll.u32 %s494_s5, 4  ;;  %s436_s10 = int_to_ptr.vmem [resolvable:$false] %s435_s10 }
  0x15   : > { %s388_s19 = smul.u32 48, %s111_s18  ;;  %s437_s11 = scalar_lea.vmem %s436_s10, 1024 }
  0x16   : > { %p433_p12 = pnand %p432_p11, %p545_p5  ;;  %p438_p0 = scmp.lt.s32.totalorder %s662_s28, %s436_s10 }
  0x17   : > { %s114_s22 = scalar_lea.vmem %s710_s0, %s388_s19  ;;  %p439_p1 = scmp.lt.s32.totalorder %s437_s11, %s431_s4 }
  0x18   : > { %v118_v0 = vld [vmem:[%s114_s22 + $0x10] sm:$0x3f]  ;;  %v119_v1 = vld [vmem:[%s114_s22 + $0x18] sm:$0x3f]  ;;  %v116_v2 = vld [vmem:[%s114_s22] sm:$0x3f]  ;;  %p434_p13 = pneg %p433_p12 }
  0x19   : > { %v560_v3 = vmul.f32 0.0625, %v118_v0  ;;  %v562_v4 = vmul.f32 0.0625, %v119_v1  ;;  %v564_v5 = vmul.f32 0.1875, %v118_v0  ;;  %v566_v6 = vmul.f32 0.1875, %v119_v1  ;;  %v117_v7 = vld [vmem:[%s114_s22 + $0x8] sm:$0x3f]  ;;  %p440_p2 = por %p439_p1, %p438_p0 }
  0x1a   : > { %v122_v8 = vmul.f32 0.0625, %v116_v2  ;;  %v126_v9 = vmul.f32 0.1875, %v116_v2  ;;  %v568_v10 = vmul.f32 0.1875, %v117_v7  ;;  %v120_v11 = vld [vmem:[%s114_s22 + $0x20] sm:$0x3f]  ;;  %v573_v13 = vmul.f32 0.5625, %v119_v1 }
  0x1b   : > { %v571_v12 = vrot.slane %v566_v6, 1  ;;  %v177_v14 = vrot.slane %v560_v3, 1  ;;  %v576_v15 = vmul.f32 0.1875, %v120_v11  ;;  %v579_v17 = vmul.f32 0.5625, %v117_v7  ;;  %v121_v20 = vld [vmem:[%s114_s22 + $0x28] sm:$0x3f]  ;;  %p441_p3 = pnand %p440_p2, %p434_p13 }
  0x1c   : > { %v135_v16 = vrot.slane %v568_v10, 1  ;;  %v175_v18 = vrot.slane %v122_v8, 1  ;;  %v581_v19 = vmul.f32 0.5625, %v120_v11  ;;  %v178_v22 = vrot.slane %v562_v4, 1 }
  0x1d   : > { %v185_v21 = vadd.f32 %v177_v14, %v564_v5  ;;  %v586_v23 = vrot.slane %v576_v15, 1  ;;  %v123_v24 = vmul.f32 0.0625, %v117_v7  ;;  %v589_v26 = vrot.slane %v564_v5, 1 }
  0x1e   : > { %v183_v25 = vadd.f32 %v175_v18, %v126_v9  ;;  %v591_v27 = vmul.f32 0.5625, %v118_v0  ;;  %v246_v28 = vadd.f32 %v579_v17, %v135_v16  ;;  %v186_v30 = vadd.f32 %v178_v22, %v566_v6 }
  0x1f   : > { %v189_v29 = vadd.f32 %v185_v21, %v573_v13  ;;  %v176_v31 = vrot.slane %v123_v24, 1  ;;  %v233_v32 = vmul.f32 0.0625, %v121_v20  ;;  %v238_v36 = vmul.f32 0.1875, %v121_v20 }
  0x20   : > { %v187_v33 = vadd.f32 %v183_v25, %v579_v17  ;;  %v247_v34 = vadd.f32 %v591_v27, %v589_v26  ;;  %v250_v35 = vadd.f32 %v246_v28, %v564_v5  ;;  %v190_v38 = vadd.f32 %v186_v30, %v581_v19 }
  0x21   : > { %v196_v37 = vadd.f32 %v189_v29, %v571_v12  ;;  %v184_v39 = vadd.f32 %v176_v31, %v568_v10  ;;  %v249_v40 = vadd.f32 %v586_v23, %v581_v19  ;;  %v257_v44 = vrot.slane %v233_v32, 1 }
  0x22   : > { %v194_v41 = vadd.f32 %v187_v33, %v135_v16  ;;  %v251_v42 = vadd.f32 %v247_v34, %v566_v6  ;;  %v260_v43 = vadd.f32 %v250_v35, %v177_v14  ;;  %v197_v46 = vadd.f32 %v586_v23, %v190_v38 }
  0x23   : > { %v204_v45 = vrot.slane %v196_v37, 1  ;;  %v188_v47 = vadd.f32 %v184_v39, %v591_v27  ;;  %v253_v48 = vadd.f32 %v249_v40, %v238_v36  ;;  %v134_v49 = vrot.slane %v126_v9, 1 }
  0x24   : > { %v202_v50 = vrot.slane %v194_v41, 1  ;;  %v261_v51 = vadd.f32 %v251_v42, %v178_v22  ;;  %v232_v52 = vmul.f32 0.0625, %v120_v11  ;;  %v205_v53 = vrot.slane %v197_v46, 1 }
  0x25   : > { %210 = vrot.lane.b32.xlu1 %v204_v45, %s493_s23  ;;  %v195_v54 = vadd.f32 %v188_v47, %v589_v26  ;;  %v268_v55 = vrot.slane %v260_v43, 1  ;;  %v248_v56 = vadd.f32 %v573_v13, %v571_v12  ;;  %v263_v57 = vadd.f32 %v257_v44, %v253_v48 }
  0x26   : > { %206 = vrot.lane.b32.xlu0 %v202_v50, %s493_s23  ;;  %v256_v58 = vrot.slane %v232_v52, 1  ;;  %v161_v59 = vrot.slane %v573_v13, 1  ;;  %v144_v60 = vadd.f32 %v589_v26, %v560_v3  ;;  %v269_v62 = vrot.slane %v261_v51, 1 }
  0x27   : > { %v203_v61 = vrot.slane %v195_v54, 1  ;;  %v252_v63 = vadd.f32 %v248_v56, %v576_v15  ;;  %v159_v0 = vrot.slane %v579_v17, 1  ;;  %v142_v2 = vadd.f32 %v134_v49, %v122_v8 }
  0x28   : > { %v149_v1 = vadd.f32 %v144_v60, %v566_v6  ;;  %v145_v7 = vadd.f32 %v571_v12, %v562_v4  ;;  %v162_v9 = vrot.slane %v581_v19, 1  ;;  %v143_v13 = vadd.f32 %v135_v16, %v123_v24 }
  0x29   : > { %212 = vrot.lane.b32.xlu1 %v205_v53, %s493_s23  ;;  %v262_v11 = vadd.f32 %v256_v58, %v252_v63  ;;  %v160_v14 = vrot.slane %v591_v27, 1  ;;  %v228_v18 = vadd.f32 %v159_v0, %v568_v10  ;;  %v147_v17 = vadd.f32 %v142_v2, %v568_v10 }
  0x2a   : > { %208 = vrot.lane.b32.xlu0 %v203_v61, %s493_s23  ;;  %v169_v20 = vadd.f32 %v161_v59, %v149_v1  ;;  %v150_v8 = vadd.f32 %v576_v15, %v145_v7  ;;  %v231_v21 = vadd.f32 %v162_v9, %v576_v15  ;;  %v271_v22 = vrot.slane %v263_v57, 1 }
  0x2b   : > { %v148_v19 = vadd.f32 %v143_v13, %v564_v5  ;;  %v229_v25 = vadd.f32 %v160_v14, %v564_v5  ;;  %v234_v16 = vadd.f32 %v228_v18, %v560_v3  ;;  %v167_v24 = vadd.f32 %v159_v0, %v147_v17 }
  0x2c   : > { %v170_v27 = vadd.f32 %v162_v9, %v150_v8  ;;  %v237_v28 = vadd.f32 %v233_v32, %v231_v21  ;;  %v240_v29 = vrot.slane %v238_v36, 1  ;;  %v230_v31 = vadd.f32 %v161_v59, %v566_v6 }
  0x2d   : > { %274 = vrot.lane.b32.xlu1 %v269_v62, %s493_s23  ;;  %v168_v10 = vadd.f32 %v160_v14, %v148_v19  ;;  %v235_v30 = vadd.f32 %v229_v25, %v562_v4  ;;  %v242_v15 = vadd.f32 %v234_v16, %v589_v26  ;;  %v270_v5 = vrot.slane %v262_v11, 1 }
  0x2e   : > { %272 = vrot.lane.b32.xlu0 %v268_v55, %s493_s23  ;;  %v245_v33 = vadd.f32 %v240_v29, %v237_v28  ;;  %v236_v34 = vadd.f32 %v232_v52, %v230_v31 }
  0x2f   : > { %v243_v3 = vadd.f32 %v235_v30, %v571_v12 }
  0x30   : > { %v244_v32 = vadd.f32 %v236_v34, %v586_v23 }
  0x31   : > { %278 = vrot.lane.b32.xlu1 %v271_v22, %s493_s23 }
  0x32   : > { %276 = vrot.lane.b32.xlu0 %v270_v5, %s493_s23 }
  0x97   : > { %v211_v4 = vpop.permute.xlu1 %210 }
  0x98   : > { %v221_v6 = vsel %vm218_vm0, %v169_v20, %v211_v4  ;;  %v207_v26 = vpop.permute.xlu0 %206 }
  0x99   : > { %226 = vst.msk [vmem:[%s109_s26 + $0x10] sm:$0xf] %vm223_vm1, %v221_v6  ;;  %v219_v12 = vsel %vm218_vm0, %v167_v24, %v207_v26 }
  0x9a   : > { %224 = vst.msk [vmem:[%s109_s26] sm:$0xf] %vm223_vm1, %v219_v12 }
  0x9b   : > { %v213_v23 = vpop.permute.xlu1 %212 }
  0x9c   : > { %v222_v35 = vsel %vm218_vm0, %v170_v27, %v213_v23  ;;  %v209_v36 = vpop.permute.xlu0 %208 }
  0x9d   : > { %227 = vst.msk [vmem:[%s109_s26 + $0x18] sm:$0xf] %vm223_vm1, %v222_v35  ;;  %v220_v37 = vsel %vm218_vm0, %v168_v10, %v209_v36 }
  0x9e   : > { %225 = vst.msk [vmem:[%s109_s26 + $0x8] sm:$0xf] %vm223_vm1, %v220_v37 }
  0x9f   : > { %v275_v38 = vpop.permute.xlu1 %274 }
  0xa0   : > { %v285_v39 = vsel %vm218_vm0, %v243_v3, %v275_v38  ;;  %v273_v40 = vpop.permute.xlu0 %272 }
  0xa1   : > { %377 = vst.msk [vmem:[%s109_s26 + $0xc] sm:$0xf] %vm223_vm1, %v285_v39  ;;  %v284_v41 = vsel %vm218_vm0, %v242_v15, %v273_v40 }
  0xa2   : > { %376 = vst.msk [vmem:[%s109_s26 + $0x4] sm:$0xf] %vm223_vm1, %v284_v41 }
  0xa3   : > { %v279_v42 = vpop.permute.xlu1 %278 }
  0xa4   : > { %v287_v43 = vsel %vm218_vm0, %v245_v33, %v279_v42  ;;  %v277_v44 = vpop.permute.xlu0 %276 }
  0xa5   : > { %379 = vst.msk [vmem:[%s109_s26 + $0x1c] sm:$0xf] %vm223_vm1, %v287_v43  ;;  %v286_v45 = vsel %vm218_vm0, %v244_v32, %v277_v44 }
  0xa6   : > { %378 = vst.msk [vmem:[%s109_s26 + $0x14] sm:$0xf] %vm223_vm1, %v286_v45 }
  0xa7   : > { %444 = shalt.err (!%p441_p3)
}
  0xa8   : > { %s445_s13 = scalar_lea.hbm %s660_s2, 512  ;;  %s449_s19 = scalar_lea.hbm %s711_s1, 1024 }
  0xa9   : > { %p446_p4 = scmp.ne.s32.totalorder %s660_s2, %s445_s13  ;;  %p450_p9 = scmp.lt.s32.totalorder %s660_s2, %s711_s1 }
  0xaa   : > { %p451_p10 = scmp.lt.s32.totalorder %s449_s19, %s445_s13 }
  0xab   : > { %p447_p7 = pnand %p446_p4, %p545_p5 }
  0xac   : > { %p452_p11 = por %p451_p10, %p450_p9 }
  0xad   : > { %p448_p8 = pneg %p447_p7 }
  0xaf   : > { %p453_p12 = pnand %p452_p11, %p448_p8 }
  0xb1   : > { %456 = shalt.err (!%p453_p12)
}
  0xb2   : > { %s495_s22 = smov 64   ;;  %s496_s23 = smov 4  }
  0xb3   : > { %389 = dma.vmem_to_hbm [thread:$0]  (%p545_p5), %s662_s28, 512, %s660_s2, %s670_s3, %s495_s22, %s495_s22, %s496_s23  }
  0xb4 PF: > { %p395_p13 = scmp.ge.s32.totalorder %s491_s9, 2  ;;  %s323_s24 = sand.u32 1, %s479_s6  }
  0xb5   : > { %s324_s25 = scalar_lea.sflag [#allocation3], %s323_s24 }
  0xb6   : > { %p392_p0 = pnand %p395_p13, %p549_p6 }
  0xb8   : > { %p393_p1 = pneg %p392_p0 }
  0xba   : > { %474 = dma.done.wait (%p393_p1), %s324_s25, 512  }
  0xbb   : > { %476 = vsyncadd (%p393_p1), %s324_s25, 4294966784  ;;  %p11_p2 = scmp.ge.s32.totalorder %s532_s12, 4   ;;  %s714_s6 = smov %s483_s7 }
  0xbc   : > { %s715_s7 = smov %s487_s8  ;;  %s716_s8 = smov %s543_s15 }
  0xbd   : > { %s717_s9 = smov %s532_s12  ;;  %13 = sbr.rel (!%p11_p2) target bundleno = 3 (0x3), region = 60 }
  0xc2   :  { %329 = vsyncpa [#allocation3], 1 }
  0xc3   :  { %331 = vsyncpa [#allocation3 + $0x1], 1 }

</bundles_post_ra>
